<compile_context>
chip_gen: v6e
topology: v6e:2x2x1
jax: 0.10.0
libtpu: 0.0.40
codegen_flags: <defaults>
</compile_context>

<pallas_src>
import math

import jax
import jax.numpy as jnp
import numpy as np
from jax.experimental import pallas as pl
from jax.experimental.pallas import tpu as pltpu


def _mrla_kernel(x_ref, wv_ref, wqm_ref, wkm_ref, hm_ref, prevk_ref, vprev_ref,
                 out_ref, ok_ref, ov_ref):
    """Block shapes per grid step (bt = batch tile, wc = w*c):
         x_ref     : (bt, h, wc)      activation, channels-last, (w, c) folded
         wv_ref    : (9, wc)          depthwise 3x3 weights, tap-major, w-border mask folded in
         wqm_ref   : (wc, c)          fused avg-pool + Wq conv1d matrix
         wkm_ref   : (wc, c)          fused avg-pool + Wk conv1d matrix
         hm_ref    : (c, wc)          per-head reduce + lane-broadcast matrix (norm folded in)
         prevk_ref : (bt, tp, c)      previous K state
         vprev_ref : (bt, tp, h, wc)  previous V state (read view of the aliased buffer)
         out_ref   : (bt, h, wc)      attention output
         ok_ref    : (bt, 1, c)       new k (wrapper concatenates with prev_K)
         ov_ref    : (bt, 1, h, wc)   new V time-slice (rest of the state buffer is aliased)
    """
    f32 = jnp.float32
    bt, h, wc = out_ref.shape
    tp, c = prevk_ref.shape[1], prevk_ref.shape[2]

    wv = wv_ref[...].astype(f32)          # (9, wc)
    wqm = wqm_ref[...].astype(f32)        # (wc, c)
    wkm = wkm_ref[...].astype(f32)        # (wc, c)
    hm = hm_ref[...].astype(f32)          # (c, wc)

    x3 = x_ref[...].astype(f32)           # (bt, h, wc)
    x2 = x3.reshape(bt * h, wc)           # sublane-only reshape (wc stays in lanes)

    # h-direction zero-pad masks built from iota % h: they zero both the image
    # top/bottom rows and the rows a sublane roll would pull in from the
    # neighbouring batch element.  (w-direction border masks are folded into
    # wv_ref by the wrapper.)
    ri = jax.lax.broadcasted_iota(jnp.int32, (bt * h, 1), 0) % h
    mask_top = (ri >= 1).astype(f32)      # tap row di == 0 reads row i-1
    mask_bot = (ri <= h - 2).astype(f32)  # tap row di == 2 reads row i+1

    # ---- Wv: depthwise 3x3 conv, padding=1, batched over the whole tile ----
    v2 = jnp.zeros((bt * h, wc), f32)
    for di in range(3):                   # static 3x3 tap loops
        sh = (1 - di) % (bt * h)
        xh = pltpu.roll(x2, sh, axis=0) if sh else x2
        if di == 0:
            xh = xh * mask_top
        elif di == 2:
            xh = xh * mask_bot
        for dj in range(3):
            sl = ((1 - dj) * c) % wc
            tap = pltpu.roll(xh, sl, axis=1) if sl else xh
            k9 = di * 3 + dj
            v2 = v2 + wv[k9:k9 + 1, :] * tap
    v3 = v2.reshape(bt, h, wc)

    # ---- adaptive avg-pool + Wq/Wk conv1d: batched (bt, wc) @ (wc, c) dots ----
    ysum = jnp.sum(x3, axis=1)                                        # (bt, wc)
    q = jnp.dot(ysum, wqm, preferred_element_type=f32)                # (bt, c)
    kn = jnp.dot(ysum, wkm, preferred_element_type=f32)               # (bt, c)

    # ---- multi-head layer attention, scores for all (batch, time) at once ----
    kprev = prevk_ref[...].astype(f32)                                # (bt, tp, c)
    qk_prev = (q[:, None, :] * kprev).reshape(bt * tp, c)
    s_prev = jnp.dot(qk_prev, hm,
                     preferred_element_type=f32).reshape(bt, tp, wc)  # (bt, tp, wc)
    s_new = jnp.dot(q * kn, hm, preferred_element_type=f32)           # (bt, wc)

    m = jnp.maximum(jnp.max(s_prev, axis=1), s_new)                   # (bt, wc)
    e_prev = jnp.exp(s_prev - m[:, None, :])                          # (bt, tp, wc)
    e_new = jnp.exp(s_new - m)                                        # (bt, wc)
    denom = jnp.sum(e_prev, axis=1) + e_new                           # (bt, wc)
    inv = pl.reciprocal(denom, approx=True)                           # EUP slot
    inv = inv * (2.0 - denom * inv)        # one Newton step -> ~f32 accurate

    # attention-weighted sum over time (tp is small and static)
    acc = (e_new * inv)[:, None, :] * v3                              # (bt, h, wc)
    vprev = vprev_ref[...].astype(f32)                                # (bt, tp, h, wc)
    for tt in range(tp):
        acc = acc + (e_prev[:, tt] * inv)[:, None, :] * vprev[:, tt]

    # ---- stores (out / V lane-dense; k is the only sub-128-lane output) ----
    out_ref[...] = acc.astype(out_ref.dtype)
    ov_ref[...] = v3[:, None].astype(ov_ref.dtype)      # only the new V slice
    ok_ref[...] = kn[:, None, :].astype(ok_ref.dtype)   # only the new k slice


def _vmem_capacity_bytes():
    """Per-core VMEM capacity (generation-aware), with a conservative fallback."""
    try:
        info = pltpu.get_tpu_info()
        cap = int(getattr(info, "vmem_capacity_bytes", 0))
        if cap > 0:
            return cap
    except Exception:
        pass
    return 64 * 1024 * 1024   # conservative fallback (v7x per-core VMEM)


def _pick_b_tile(b, per_batch_bytes, resident_bytes, cap):
    # Budget: half of per-core VMEM (capped), minus the grid-invariant weight
    # blocks; every pipelined block is counted double-buffered.
    budget = min(cap // 2, 96 * 1024 * 1024) - 2 * resident_bytes
    budget = max(budget, 2 * per_batch_bytes)            # always allow bt = 1
    divisors = [d for d in range(1, b + 1) if b % d == 0]
    fits = [d for d in divisors if 2 * d * per_batch_bytes <= budget] or [1]
    if cap <= 64 * 1024 * 1024:
        # v7x-class: 64 MiB/core but 2 TensorCores -> keep >= 2 grid steps when
        # possible so both cores get work.
        pref = [d for d in fits if b // d >= 2] or fits
    else:
        # single-core v5e/v6e (128 MiB): fewer, bigger steps are strictly better.
        pref = fits
    return max(pref)


def mrla_forward(x, prev_K, v_state, wq, wk, wv, heads):
    """MRLA-base forward (recurrent path), channels-last, in-place V state.

    x:       (b, h, w, c)          activation, channels-last (f32 or bf16)
    prev_K:  (b, tp, c)            previous K state (tp >= 1)
    v_state: (b, t_cap, h, w, c)   V state buffer; slices [0:tp] hold prev_V,
                                   t_cap >= tp + 1.  Slice tp is written in
                                   place (buffer aliased to the output).
    wq, wk:  (k_size,)             Conv1d(1, 1, k_size, bias=False) weights (odd k)
    wv:      (c, 3, 3)             depthwise Conv2d(c, c, 3, pad=1, groups=c) weights
    Returns (out (b,h,w,c), K (b,tp+1,c), v_state (b,t_cap,h,w,c)).
    """
    b, h, w, c = x.shape
    tp = prev_K.shape[1]
    if tp < 1:
        # TODO(synk): init_cell=True branch (no prev state) is not implemented.
        raise NotImplementedError("init_cell=True path not implemented")
    t_cap = v_state.shape[1]
    assert t_cap >= tp + 1
    wc = w * c
    d = c // heads
    ks = wq.shape[0]
    pad = (ks - 1) // 2
    norm_fact = 1.0 / math.sqrt(c / heads)
    f32 = jnp.float32

    # Free reshapes only (merge of the two minor dims): no transposes, no pads.
    # The V reshape is bitcast-compatible so the input/output alias below keeps
    # the update in place.
    x_f = x.reshape(b, h, wc)
    v_f = v_state.reshape(b, t_cap, h, wc)

    # ---- tiny precomputed weight matrices (cache these once in a real model) ----
    # depthwise weights, tap-major, tiled across w, w-border zero mask folded in
    wv9 = jnp.transpose(wv.reshape(c, 9), (1, 0)).astype(f32)              # (9, c)
    jw = jnp.arange(w)
    djs = jnp.arange(3)
    w_valid = ((jw[None, :] + djs[:, None] - 1 >= 0) &
               (jw[None, :] + djs[:, None] - 1 < w)).astype(f32)           # (3, w)
    wv_tiled = (w_valid[jnp.arange(9) % 3][:, :, None]
                * wv9[:, None, :]).reshape(9, wc)                          # (9, wc)

    # fused avg-pool + 1-D channel conv:  Wq(avgpool(x)) == (sum_h x_folded) @ wqm
    def conv1d_matrix(wt):
        offs = jnp.arange(c)[:, None] - jnp.arange(c)[None, :] + pad       # (src, dst)
        band = jnp.where((offs >= 0) & (offs < ks),
                         wt[jnp.clip(offs, 0, ks - 1)], 0.0)               # (c, c)
        return jnp.tile(band, (w, 1)).astype(f32) / float(h * w)           # (wc, c)

    wqm = conv1d_matrix(wq.astype(f32))
    wkm = conv1d_matrix(wk.astype(f32))

    # per-head reduce + lane broadcast matrix, norm factor folded in
    row_head = jnp.arange(c) // d
    col_head = (jnp.arange(wc) % c) // d
    hm = (row_head[:, None] == col_head[None, :]).astype(f32) * norm_fact  # (c, wc)

    # ---- generation-aware VMEM budget / batch tile ----
    cap = _vmem_capacity_bytes()
    per_batch_bytes = (2 * h * wc * x.dtype.itemsize                  # x + out blocks
                       + (tp + 1) * h * wc * v_state.dtype.itemsize   # prev_V + new V slice
                       + (tp + 2) * c * prev_K.dtype.itemsize)        # prev_K + new k
    resident_bytes = 4 * (9 * wc + 2 * wc * c + c * wc)               # f32 weight blocks
    bt = _pick_b_tile(b, per_batch_bytes, resident_bytes, cap)
    grid = (b // bt,)
    vmem_limit = int(max(32 * 1024 * 1024, min(cap * 3 // 4, 100 * 1024 * 1024)))

    out_f, new_k, out_Vf = pl.pallas_call(
        _mrla_kernel,
        grid=grid,
        in_specs=[
            pl.BlockSpec((bt, h, wc), lambda i: (i, 0, 0)),
            pl.BlockSpec((9, wc), lambda i: (0, 0)),
            pl.BlockSpec((wc, c), lambda i: (0, 0)),
            pl.BlockSpec((wc, c), lambda i: (0, 0)),
            pl.BlockSpec((c, wc), lambda i: (0, 0)),
            pl.BlockSpec((bt, tp, c), lambda i: (i, 0, 0)),
            pl.BlockSpec((bt, tp, h, wc), lambda i: (i, 0, 0, 0)),
        ],
        out_specs=[
            pl.BlockSpec((bt, h, wc), lambda i: (i, 0, 0)),
            pl.BlockSpec((bt, 1, c), lambda i: (i, 0, 0)),
            pl.BlockSpec((bt, 1, h, wc), lambda i: (i, tp, 0, 0)),
        ],
        out_shape=(
            jax.ShapeDtypeStruct((b, h, wc), x.dtype),
            jax.ShapeDtypeStruct((b, 1, c), prev_K.dtype),
            jax.ShapeDtypeStruct((b, t_cap, h, wc), v_state.dtype),
        ),
        input_output_aliases={6: 2},   # V state buffer updated in place
        compiler_params=pltpu.CompilerParams(
            dimension_semantics=("parallel",),
            vmem_limit_bytes=vmem_limit,
        ),
    )(x_f, wv_tiled, wqm, wkm, hm, prev_K, v_f)

    out_K = jnp.concatenate([prev_K, new_k], axis=1)   # tiny; avoids lane-sparse in-kernel copy
    return (out_f.reshape(b, h, w, c), out_K, out_Vf.reshape(b, t_cap, h, w, c))


def mrla_reference(x, prev_K, prev_V, wq, wk, wv, heads):
    """Pure-JAX reference mirroring the PyTorch forward (NCHW)."""
    b, c, h, w = x.shape
    d = c // heads
    ks = wq.shape[0]
    pad = (ks - 1) // 2

    y = jnp.mean(x, axis=(2, 3))                               # (b, c)  avg_pool
    ypad = jnp.pad(y, ((0, 0), (pad, pad)))

    def conv1d(wt):
        return sum(wt[j] * ypad[:, j:j + c] for j in range(ks))

    Q = conv1d(wq)                                             # (b, c)
    Kn = conv1d(wk)                                            # (b, c)

    xp = jnp.pad(x, ((0, 0), (0, 0), (1, 1), (1, 1)))
    v = sum(wv[:, di, dj][None, :, None, None] * xp[:, :, di:di + h, dj:dj + w]
            for di in range(3) for dj in range(3))             # (b, c, h, w)

    K = jnp.concatenate([prev_K, Kn[:, None, :]], axis=1)      # (b, t, c)
    V = jnp.concatenate([prev_V, v[:, None]], axis=1)          # (b, t, c, h, w)
    t = K.shape[1]

    Qh = Q.reshape(b, heads, 1, d)
    Kh = K.reshape(b, t, heads, d).transpose(0, 2, 1, 3)       # (b, g, t, d)
    Vh = V.reshape(b, t, heads, d, h, w).transpose(0, 2, 1, 3, 4, 5)
    atten = jnp.einsum('bgid,bgjd->bgij', Qh, Kh) * (1.0 / math.sqrt(c / heads))
    atten = jax.nn.softmax(atten, axis=-1)                     # (b, g, 1, t)
    Vflat = Vh.reshape(b, heads, t, d * h * w)
    out = jnp.einsum('bgit,bgtj->bgij', atten, Vflat)          # (b, g, 1, d*h*w)
    out = out.reshape(b, c, h, w)
    return out, K, V


if __name__ == "__main__":
    b, c, h, w = 2, 16, 8, 8          # w*c == 128 -> fully lane-dense blocks
    dim_perhead = 4
    heads = c // dim_perhead
    t_prev = 1
    tlog = int(abs((math.log(c, 2) + 1) / 2.0))
    k_size = tlog if tlog % 2 else tlog + 1                    # == 3 for c=16

    key = jax.random.PRNGKey(0)
    kx, kpk, kpv, kq, kk, kv_ = jax.random.split(key, 6)
    x_nchw = jax.random.normal(kx, (b, c, h, w), jnp.float32)
    prev_K = jax.random.normal(kpk, (b, t_prev, c), jnp.float32)
    prev_V_nchw = jax.random.normal(kpv, (b, t_prev, c, h, w), jnp.float32)
    wq = jax.random.normal(kq, (k_size,), jnp.float32) * 0.2   # Conv1d(1,1,k) weight
    wk = jax.random.normal(kk, (k_size,), jnp.float32) * 0.2   # Conv1d(1,1,k) weight
    wv = jax.random.normal(kv_, (c, 3, 3), jnp.float32) * 0.2  # depthwise Conv2d weight

    # The kernel is channels-last end-to-end; these transposes only adapt the
    # PyTorch-convention test data / NCHW reference (test plumbing, not part
    # of the kernel's hot path).
    x_nhwc = jnp.transpose(x_nchw, (0, 2, 3, 1))
    v_state = jnp.zeros((b, t_prev + 1, h, w, c), jnp.float32)
    v_state = v_state.at[:, :t_prev].set(jnp.transpose(prev_V_nchw, (0, 1, 3, 4, 2)))

    out_nhwc, out_K, v_state_new = mrla_forward(x_nhwc, prev_K, v_state,
                                                wq, wk, wv, heads)
    jax.block_until_ready((out_nhwc, out_K, v_state_new))

    ref_out, ref_K, ref_V = mrla_reference(x_nchw, prev_K, prev_V_nchw, wq, wk, wv, heads)
    np.testing.assert_allclose(np.asarray(jnp.transpose(out_nhwc, (0, 3, 1, 2))),
                               np.asarray(ref_out), rtol=2e-4, atol=2e-4)
    np.testing.assert_allclose(np.asarray(out_K), np.asarray(ref_K),
                               rtol=1e-4, atol=1e-4)
    np.testing.assert_allclose(np.asarray(jnp.transpose(v_state_new, (0, 1, 4, 2, 3))),
                               np.asarray(ref_V), rtol=1e-4, atol=1e-4)

    print("KERNEL_OK")
</pallas_src>

<mosaic_0001>
module attributes {stable_mosaic.version = 11 : i64} {
  func.func @_mrla_kernel(%arg0: i32, %arg1: memref<1x8x128xf32, #tpu.memory_space<vmem>>, %arg2: memref<9x128xf32, #tpu.memory_space<vmem>>, %arg3: memref<128x16xf32, #tpu.memory_space<vmem>>, %arg4: memref<128x16xf32, #tpu.memory_space<vmem>>, %arg5: memref<16x128xf32, #tpu.memory_space<vmem>>, %arg6: memref<1x1x16xf32, #tpu.memory_space<vmem>>, %arg7: memref<1x1x8x128xf32, #tpu.memory_space<vmem>>, %arg8: memref<1x8x128xf32, #tpu.memory_space<vmem>>, %arg9: memref<1x1x16xf32, #tpu.memory_space<vmem>>, %arg10: memref<1x1x8x128xf32, #tpu.memory_space<vmem>>) attributes {dimension_semantics = [#tpu.dimension_semantics<parallel>], iteration_bounds = array<i64: 2>, scalar_prefetch = 0 : i64, scratch_operands = 0 : i64, tpu.core_type = #tpu.core_type<tc>, window_params = [{transform_indices = @transform_0, window_bounds = array<i64: 1, 8, 128>}, {pipeline_mode = #tpu.pipeline_mode<synchronous>, transform_indices = @transform_1, window_bounds = array<i64: 9, 128>}, {pipeline_mode = #tpu.pipeline_mode<synchronous>, transform_indices = @transform_2, window_bounds = array<i64: 128, 16>}, {pipeline_mode = #tpu.pipeline_mode<synchronous>, transform_indices = @transform_3, window_bounds = array<i64: 128, 16>}, {pipeline_mode = #tpu.pipeline_mode<synchronous>, transform_indices = @transform_4, window_bounds = array<i64: 16, 128>}, {transform_indices = @transform_5, window_bounds = array<i64: 1, 1, 16>}, {transform_indices = @transform_6, window_bounds = array<i64: 1, 1, 8, 128>}, {transform_indices = @transform_7, window_bounds = array<i64: 1, 8, 128>}, {transform_indices = @transform_8, window_bounds = array<i64: 1, 1, 16>}, {transform_indices = @transform_9, window_bounds = array<i64: 1, 1, 8, 128>}]} {
    %c0 = arith.constant 0 : index
    %c0_0 = arith.constant 0 : index
    %0 = vector.load %arg2[%c0, %c0_0] : memref<9x128xf32, #tpu.memory_space<vmem>>, vector<9x128xf32>
    %c0_1 = arith.constant 0 : index
    %c0_2 = arith.constant 0 : index
    %1 = vector.load %arg3[%c0_1, %c0_2] : memref<128x16xf32, #tpu.memory_space<vmem>>, vector<128x16xf32>
    %c0_3 = arith.constant 0 : index
    %c0_4 = arith.constant 0 : index
    %2 = vector.load %arg4[%c0_3, %c0_4] : memref<128x16xf32, #tpu.memory_space<vmem>>, vector<128x16xf32>
    %c0_5 = arith.constant 0 : index
    %c0_6 = arith.constant 0 : index
    %3 = vector.load %arg5[%c0_5, %c0_6] : memref<16x128xf32, #tpu.memory_space<vmem>>, vector<16x128xf32>
    %c0_7 = arith.constant 0 : index
    %c0_8 = arith.constant 0 : index
    %c0_9 = arith.constant 0 : index
    %4 = vector.load %arg1[%c0_7, %c0_8, %c0_9] : memref<1x8x128xf32, #tpu.memory_space<vmem>>, vector<1x8x128xf32>
    %5 = vector.shape_cast %4 : vector<1x8x128xf32> to vector<8x128xf32>
    %6 = tpu.iota {dimensions = array<i32: 0>} : vector<8x1xi32>
    %c8_i32 = arith.constant 8 : i32
    %c0_i32 = arith.constant 0 : i32
    %7 = arith.cmpi eq, %c8_i32, %c0_i32 : i32
    %c1_i32 = arith.constant 1 : i32
    %8 = arith.select %7, %c1_i32, %c8_i32 : i32
    %9 = vector.broadcast %8 : i32 to vector<8x1xi32>
    %10 = arith.remsi %6, %9 : vector<8x1xi32>
    %c0_i32_10 = arith.constant 0 : i32
    %11 = vector.broadcast %c0_i32_10 : i32 to vector<8x1xi32>
    %12 = arith.cmpi ne, %10, %11 : vector<8x1xi32>
    %c0_i32_11 = arith.constant 0 : i32
    %13 = vector.broadcast %c0_i32_11 : i32 to vector<8x1xi32>
    %14 = arith.cmpi slt, %10, %13 : vector<8x1xi32>
    %c0_i32_12 = arith.constant 0 : i32
    %15 = arith.cmpi slt, %8, %c0_i32_12 : i32
    %16 = vector.broadcast %15 : i1 to vector<8x1xi1>
    %17 = vector.broadcast %16 : vector<8x1xi1> to vector<8x1xi1>
    %18 = arith.xori %14, %17 : vector<8x1xi1>
    %19 = arith.andi %18, %12 : vector<8x1xi1>
    %20 = vector.broadcast %8 : i32 to vector<8x1xi32>
    %21 = arith.addi %10, %20 : vector<8x1xi32>
    %22 = arith.select %19, %21, %10 : vector<8x1xi1>, vector<8x1xi32>
    %c1_i32_13 = arith.constant 1 : i32
    %23 = vector.broadcast %c1_i32_13 : i32 to vector<8x1xi32>
    %24 = arith.cmpi sge, %22, %23 : vector<8x1xi32>
    %25 = arith.extui %24 : vector<8x1xi1> to vector<8x1xi32>
    %26 = arith.sitofp %25 : vector<8x1xi32> to vector<8x1xf32>
    %c6_i32 = arith.constant 6 : i32
    %27 = vector.broadcast %c6_i32 : i32 to vector<8x1xi32>
    %28 = arith.cmpi sle, %22, %27 : vector<8x1xi32>
    %29 = arith.extui %28 : vector<8x1xi1> to vector<8x1xi32>
    %30 = arith.sitofp %29 : vector<8x1xi32> to vector<8x1xf32>
    %cst = arith.constant 0.000000e+00 : f32
    %31 = vector.broadcast %cst : f32 to vector<8x128xf32>
    %c1_i32_14 = arith.constant 1 : i32
    %32 = tpu.dynamic_rotate %5 by %c1_i32_14 dim 0 : vector<8x128xf32>, i32 -> vector<8x128xf32>
    %33 = vector.broadcast %26 : vector<8x1xf32> to vector<8x128xf32>
    %34 = arith.mulf %32, %33 : vector<8x128xf32>
    %c16_i32 = arith.constant 16 : i32
    %35 = tpu.dynamic_rotate %34 by %c16_i32 dim 1 : vector<8x128xf32>, i32 -> vector<8x128xf32>
    %36 = vector.extract_strided_slice %0 {offsets = [0, 0], sizes = [1, 128], strides = [1, 1]} : vector<9x128xf32> to vector<1x128xf32>
    %37 = vector.broadcast %36 : vector<1x128xf32> to vector<8x128xf32>
    %38 = arith.mulf %37, %35 : vector<8x128xf32>
    %39 = arith.addf %31, %38 : vector<8x128xf32>
    %40 = vector.extract_strided_slice %0 {offsets = [1, 0], sizes = [1, 128], strides = [1, 1]} : vector<9x128xf32> to vector<1x128xf32>
    %41 = vector.broadcast %40 : vector<1x128xf32> to vector<8x128xf32>
    %42 = arith.mulf %41, %34 : vector<8x128xf32>
    %43 = arith.addf %39, %42 : vector<8x128xf32>
    %c112_i32 = arith.constant 112 : i32
    %44 = tpu.dynamic_rotate %34 by %c112_i32 dim 1 : vector<8x128xf32>, i32 -> vector<8x128xf32>
    %45 = vector.extract_strided_slice %0 {offsets = [2, 0], sizes = [1, 128], strides = [1, 1]} : vector<9x128xf32> to vector<1x128xf32>
    %46 = vector.broadcast %45 : vector<1x128xf32> to vector<8x128xf32>
    %47 = arith.mulf %46, %44 : vector<8x128xf32>
    %48 = arith.addf %43, %47 : vector<8x128xf32>
    %c16_i32_15 = arith.constant 16 : i32
    %49 = tpu.dynamic_rotate %5 by %c16_i32_15 dim 1 : vector<8x128xf32>, i32 -> vector<8x128xf32>
    %50 = vector.extract_strided_slice %0 {offsets = [3, 0], sizes = [1, 128], strides = [1, 1]} : vector<9x128xf32> to vector<1x128xf32>
    %51 = vector.broadcast %50 : vector<1x128xf32> to vector<8x128xf32>
    %52 = arith.mulf %51, %49 : vector<8x128xf32>
    %53 = arith.addf %48, %52 : vector<8x128xf32>
    %54 = vector.extract_strided_slice %0 {offsets = [4, 0], sizes = [1, 128], strides = [1, 1]} : vector<9x128xf32> to vector<1x128xf32>
    %55 = vector.broadcast %54 : vector<1x128xf32> to vector<8x128xf32>
    %56 = arith.mulf %55, %5 : vector<8x128xf32>
    %57 = arith.addf %53, %56 : vector<8x128xf32>
    %c112_i32_16 = arith.constant 112 : i32
    %58 = tpu.dynamic_rotate %5 by %c112_i32_16 dim 1 : vector<8x128xf32>, i32 -> vector<8x128xf32>
    %59 = vector.extract_strided_slice %0 {offsets = [5, 0], sizes = [1, 128], strides = [1, 1]} : vector<9x128xf32> to vector<1x128xf32>
    %60 = vector.broadcast %59 : vector<1x128xf32> to vector<8x128xf32>
    %61 = arith.mulf %60, %58 : vector<8x128xf32>
    %62 = arith.addf %57, %61 : vector<8x128xf32>
    %c7_i32 = arith.constant 7 : i32
    %63 = tpu.dynamic_rotate %5 by %c7_i32 dim 0 : vector<8x128xf32>, i32 -> vector<8x128xf32>
    %64 = vector.broadcast %30 : vector<8x1xf32> to vector<8x128xf32>
    %65 = arith.mulf %63, %64 : vector<8x128xf32>
    %c16_i32_17 = arith.constant 16 : i32
    %66 = tpu.dynamic_rotate %65 by %c16_i32_17 dim 1 : vector<8x128xf32>, i32 -> vector<8x128xf32>
    %67 = vector.extract_strided_slice %0 {offsets = [6, 0], sizes = [1, 128], strides = [1, 1]} : vector<9x128xf32> to vector<1x128xf32>
    %68 = vector.broadcast %67 : vector<1x128xf32> to vector<8x128xf32>
    %69 = arith.mulf %68, %66 : vector<8x128xf32>
    %70 = arith.addf %62, %69 : vector<8x128xf32>
    %71 = vector.extract_strided_slice %0 {offsets = [7, 0], sizes = [1, 128], strides = [1, 1]} : vector<9x128xf32> to vector<1x128xf32>
    %72 = vector.broadcast %71 : vector<1x128xf32> to vector<8x128xf32>
    %73 = arith.mulf %72, %65 : vector<8x128xf32>
    %74 = arith.addf %70, %73 : vector<8x128xf32>
    %c112_i32_18 = arith.constant 112 : i32
    %75 = tpu.dynamic_rotate %65 by %c112_i32_18 dim 1 : vector<8x128xf32>, i32 -> vector<8x128xf32>
    %76 = vector.extract_strided_slice %0 {offsets = [8, 0], sizes = [1, 128], strides = [1, 1]} : vector<9x128xf32> to vector<1x128xf32>
    %77 = vector.broadcast %76 : vector<1x128xf32> to vector<8x128xf32>
    %78 = arith.mulf %77, %75 : vector<8x128xf32>
    %79 = arith.addf %74, %78 : vector<8x128xf32>
    %80 = vector.shape_cast %79 : vector<8x128xf32> to vector<1x8x128xf32>
    %cst_19 = arith.constant dense<0.000000e+00> : vector<1x128xf32>
    %81 = vector.multi_reduction <add>, %4, %cst_19 [1] : vector<1x8x128xf32> to vector<1x128xf32>
    %cst_20 = arith.constant dense<0.000000e+00> : vector<1x16xf32>
    %82 = tpu.matmul %81, %1, %cst_20 {dimension_numbers = #tpu.dot_dimension_numbers<[1], [0], [0], [1], [0, 0, 1, 1], [], []>} : vector<1x128xf32>, vector<128x16xf32>, vector<1x16xf32> -> vector<1x16xf32>
    %cst_21 = arith.constant dense<0.000000e+00> : vector<1x16xf32>
    %83 = tpu.matmul %81, %2, %cst_21 {dimension_numbers = #tpu.dot_dimension_numbers<[1], [0], [0], [1], [0, 0, 1, 1], [], []>} : vector<1x128xf32>, vector<128x16xf32>, vector<1x16xf32> -> vector<1x16xf32>
    %c0_22 = arith.constant 0 : index
    %c0_23 = arith.constant 0 : index
    %c0_24 = arith.constant 0 : index
    %84 = vector.load %arg6[%c0_22, %c0_23, %c0_24] : memref<1x1x16xf32, #tpu.memory_space<vmem>>, vector<1x1x16xf32>
    %85 = vector.shape_cast %82 : vector<1x16xf32> to vector<1x1x16xf32>
    %86 = arith.mulf %85, %84 : vector<1x1x16xf32>
    %87 = vector.shape_cast %86 : vector<1x1x16xf32> to vector<1x16xf32>
    %cst_25 = arith.constant dense<0.000000e+00> : vector<1x128xf32>
    %88 = tpu.matmul %87, %3, %cst_25 {dimension_numbers = #tpu.dot_dimension_numbers<[1], [0], [0], [1], [0, 0, 1, 1], [], []>} : vector<1x16xf32>, vector<16x128xf32>, vector<1x128xf32> -> vector<1x128xf32>
    %89 = vector.shape_cast %88 : vector<1x128xf32> to vector<1x1x128xf32>
    %90 = arith.mulf %82, %83 : vector<1x16xf32>
    %cst_26 = arith.constant dense<0.000000e+00> : vector<1x128xf32>
    %91 = tpu.matmul %90, %3, %cst_26 {dimension_numbers = #tpu.dot_dimension_numbers<[1], [0], [0], [1], [0, 0, 1, 1], [], []>} : vector<1x16xf32>, vector<16x128xf32>, vector<1x128xf32> -> vector<1x128xf32>
    %cst_27 = arith.constant dense<0xFF800000> : vector<1x128xf32>
    %92 = vector.multi_reduction <maximumf>, %89, %cst_27 [1] : vector<1x1x128xf32> to vector<1x128xf32>
    %93 = arith.maximumf %92, %91 : vector<1x128xf32>
    %94 = vector.shape_cast %93 : vector<1x128xf32> to vector<1x1x128xf32>
    %95 = arith.subf %89, %94 : vector<1x1x128xf32>
    %96 = math.exp %95 : vector<1x1x128xf32>
    %97 = arith.subf %91, %93 : vector<1x128xf32>
    %98 = math.exp %97 : vector<1x128xf32>
    %cst_28 = arith.constant dense<0.000000e+00> : vector<1x128xf32>
    %99 = vector.multi_reduction <add>, %96, %cst_28 [1] : vector<1x1x128xf32> to vector<1x128xf32>
    %100 = arith.addf %99, %98 : vector<1x128xf32>
    %101 = tpu.reciprocal %100 {approx = true} : vector<1x128xf32> -> vector<1x128xf32>
    %102 = arith.mulf %100, %101 : vector<1x128xf32>
    %cst_29 = arith.constant 2.000000e+00 : f32
    %103 = vector.broadcast %cst_29 : f32 to vector<1x128xf32>
    %104 = arith.subf %103, %102 : vector<1x128xf32>
    %105 = arith.mulf %101, %104 : vector<1x128xf32>
    %106 = arith.mulf %98, %105 : vector<1x128xf32>
    %107 = vector.shape_cast %106 : vector<1x128xf32> to vector<1x1x128xf32>
    %108 = vector.broadcast %107 : vector<1x1x128xf32> to vector<1x8x128xf32>
    %109 = arith.mulf %108, %80 : vector<1x8x128xf32>
    %c0_30 = arith.constant 0 : index
    %c0_31 = arith.constant 0 : index
    %c0_32 = arith.constant 0 : index
    %c0_33 = arith.constant 0 : index
    %110 = vector.load %arg7[%c0_30, %c0_31, %c0_32, %c0_33] : memref<1x1x8x128xf32, #tpu.memory_space<vmem>>, vector<1x1x8x128xf32>
    %111 = vector.shape_cast %96 : vector<1x1x128xf32> to vector<1x128xf32>
    %112 = arith.mulf %111, %105 : vector<1x128xf32>
    %113 = vector.shape_cast %112 : vector<1x128xf32> to vector<1x1x128xf32>
    %114 = vector.shape_cast %110 : vector<1x1x8x128xf32> to vector<1x8x128xf32>
    %115 = vector.broadcast %113 : vector<1x1x128xf32> to vector<1x8x128xf32>
    %116 = arith.mulf %115, %114 : vector<1x8x128xf32>
    %117 = arith.addf %109, %116 : vector<1x8x128xf32>
    %c0_34 = arith.constant 0 : index
    %c0_35 = arith.constant 0 : index
    %c0_36 = arith.constant 0 : index
    %118 = vector.load %arg8[%c0_34, %c0_35, %c0_36] : memref<1x8x128xf32, #tpu.memory_space<vmem>>, vector<1x8x128xf32>
    tpu.vector_store %arg8[%c0_34, %c0_35, %c0_36], %117 {strides = array<i32>} : memref<1x8x128xf32, #tpu.memory_space<vmem>>, vector<1x8x128xf32>,
    %119 = vector.shape_cast %80 : vector<1x8x128xf32> to vector<1x1x8x128xf32>
    %c0_37 = arith.constant 0 : index
    %c0_38 = arith.constant 0 : index
    %c0_39 = arith.constant 0 : index
    %c0_40 = arith.constant 0 : index
    %120 = vector.load %arg10[%c0_37, %c0_38, %c0_39, %c0_40] : memref<1x1x8x128xf32, #tpu.memory_space<vmem>>, vector<1x1x8x128xf32>
    tpu.vector_store %arg10[%c0_37, %c0_38, %c0_39, %c0_40], %119 {strides = array<i32>} : memref<1x1x8x128xf32, #tpu.memory_space<vmem>>, vector<1x1x8x128xf32>,
    %121 = vector.shape_cast %83 : vector<1x16xf32> to vector<1x1x16xf32>
    %c0_41 = arith.constant 0 : index
    %c0_42 = arith.constant 0 : index
    %c0_43 = arith.constant 0 : index
    %122 = vector.load %arg9[%c0_41, %c0_42, %c0_43] : memref<1x1x16xf32, #tpu.memory_space<vmem>>, vector<1x1x16xf32>
    tpu.vector_store %arg9[%c0_41, %c0_42, %c0_43], %121 {strides = array<i32>} : memref<1x1x16xf32, #tpu.memory_space<vmem>>, vector<1x1x16xf32>,
    return
  }
  func.func @transform_0(%arg0: i32) -> (i32, i32, i32) {
    %c0_i32 = arith.constant 0 : i32
    %c0_i32_0 = arith.constant 0 : i32
    %c0_i32_1 = arith.constant 0 : i32
    return %arg0, %c0_i32, %c0_i32_0 : i32, i32, i32
  }
  func.func @transform_1(%arg0: i32) -> (i32, i32) {
    %c0_i32 = arith.constant 0 : i32
    %c0_i32_0 = arith.constant 0 : i32
    %c0_i32_1 = arith.constant 0 : i32
    return %c0_i32, %c0_i32_0 : i32, i32
  }
  func.func @transform_2(%arg0: i32) -> (i32, i32) {
    %c0_i32 = arith.constant 0 : i32
    %c0_i32_0 = arith.constant 0 : i32
    %c0_i32_1 = arith.constant 0 : i32
    return %c0_i32, %c0_i32_0 : i32, i32
  }
  func.func @transform_3(%arg0: i32) -> (i32, i32) {
    %c0_i32 = arith.constant 0 : i32
    %c0_i32_0 = arith.constant 0 : i32
    %c0_i32_1 = arith.constant 0 : i32
    return %c0_i32, %c0_i32_0 : i32, i32
  }
  func.func @transform_4(%arg0: i32) -> (i32, i32) {
    %c0_i32 = arith.constant 0 : i32
    %c0_i32_0 = arith.constant 0 : i32
    %c0_i32_1 = arith.constant 0 : i32
    return %c0_i32, %c0_i32_0 : i32, i32
  }
  func.func @transform_5(%arg0: i32) -> (i32, i32, i32) {
    %c0_i32 = arith.constant 0 : i32
    %c0_i32_0 = arith.constant 0 : i32
    %c0_i32_1 = arith.constant 0 : i32
    return %arg0, %c0_i32, %c0_i32_0 : i32, i32, i32
  }
  func.func @transform_6(%arg0: i32) -> (i32, i32, i32, i32) {
    %c0_i32 = arith.constant 0 : i32
    %c0_i32_0 = arith.constant 0 : i32
    %c0_i32_1 = arith.constant 0 : i32
    %c0_i32_2 = arith.constant 0 : i32
    return %arg0, %c0_i32, %c0_i32_0, %c0_i32_1 : i32, i32, i32, i32
  }
  func.func @transform_7(%arg0: i32) -> (i32, i32, i32) {
    %c0_i32 = arith.constant 0 : i32
    %c0_i32_0 = arith.constant 0 : i32
    %c0_i32_1 = arith.constant 0 : i32
    return %arg0, %c0_i32, %c0_i32_0 : i32, i32, i32
  }
  func.func @transform_8(%arg0: i32) -> (i32, i32, i32) {
    %c0_i32 = arith.constant 0 : i32
    %c0_i32_0 = arith.constant 0 : i32
    %c0_i32_1 = arith.constant 0 : i32
    return %arg0, %c0_i32, %c0_i32_0 : i32, i32, i32
  }
  func.func @transform_9(%arg0: i32) -> (i32, i32, i32, i32) {
    %c1_i32 = arith.constant 1 : i32
    %c0_i32 = arith.constant 0 : i32
    %c0_i32_0 = arith.constant 0 : i32
    %c0_i32_1 = arith.constant 0 : i32
    return %arg0, %c1_i32, %c0_i32, %c0_i32_0 : i32, i32, i32, i32
  }
}

</mosaic_0001>

<bundles_post_ra>
// kernel: tpu_custom_call.1
= control target key start
LH: loop header
LB: loop body
LE: loop exit
PB: predicated region body
PF: predicated region fallthrough
CT: control target
= control target key end

     0   :  { %s1859_s0 = inlined_call_operand.vmem [shape: f32[2,8,128], index: 0, kind: input, shape index: {}]   ;;  %s1860_s1 = inlined_call_operand.vmem [shape: f32[9,128], index: 1, kind: input, shape index: {}]   ;;  %s1861_s2 = inlined_call_operand.vmem [shape: f32[128,16], index: 2, kind: input, shape index: {}]   ;;  %s1862_s3 = inlined_call_operand.vmem [shape: f32[128,16], index: 3, kind: input, shape index: {}]   ;;  %s1863_s4 = inlined_call_operand.vmem [shape: f32[16,128], index: 4, kind: input, shape index: {}]   ;;  %s1864_s5 = inlined_call_operand.vmem [shape: f32[2,1,16], index: 5, kind: input, shape index: {}]   ;;  %s1865_s6 = inlined_call_operand.hbm [shape: f32[2,2,8,128], index: 6, kind: input, shape index: {}, may-alias: {6,9}]   ;;  %s1866_s7 = inlined_call_operand.hbm [shape: f32[2,8,128], index: 7, kind: output, shape index: {0}]   ;;  %s1867_s8 = inlined_call_operand.hbm [shape: f32[2,1,16], index: 8, kind: output, shape index: {1}]   ;;  %s1868_s9 = inlined_call_operand.hbm [shape: f32[2,2,8,128], index: 9, kind: output, shape index: {2}, may-alias: {6,9}]  }
   0x1   :  { %1874 = sst [smem:[#allocation14_spill]] %s1859_s0 }
   0x2   :  { %1875 = sst [smem:[#allocation15_spill]] %s1860_s1 }
   0x3   :  { %15 = vsyncpa [#allocation3], 0 }
   0x4   :  { %17 = vsyncpa [#allocation3 + $0x1], 0 }
   0x5   :  { %18 = vsyncpa [#allocation4], 0 }
   0x6   :  { %20 = vsyncpa [#allocation4 + $0x1], 0 }
   0x7   :  { %21 = vsyncpa [#allocation7], 0 }
   0x8   :  { %23 = vsyncpa [#allocation7 + $0x1], 0  ;;  %s1477_s30 = smov 0   ;;  %s1479_s10 = smov 0  }
   0x9   :  { %s1481_s11 = smov 0   ;;  %s1483_s12 = smov 0  }
   0xa LB: > { %1876 = sst [smem:[#allocation12_spill]] %s1413_s11  ;;  %s1498_s13 = sadd.s32 4294967295, %s1417_s12   ;;  %s1417_s12 = sphi %s1483_s12, %s1898_s12   ;;  %s1413_s11 = sphi %s1481_s11, %s1895_s11   ;;  %s1409_s10 = sphi %s1479_s10, %s1897_s10   ;;  %s1405_s30 = sphi %s1477_s30, %s1896_s30  }
   0xb   : > { %s1869_s14 = sadd.s32 4294967294, %s1417_s12   ;;  %s1502_s15 = sadd.s32 1, %s1417_s12  }
   0xc   : > { %s172_s16 = sadd.s32 1, %s1413_s11  ;;  %s169_s17 = ssub.s32 %s1417_s12, %s1502_s15 }
   0xd   : > { %p179_p0 = scmp.ne.s32.totalorder %s1413_s11, %s1409_s10  ;;  %p170_p1 = scmp.eq.s32.totalorder %s169_s17, 0 }
   0xe   : > { %p180_p2 = scmp.eq.s32.totalorder %s1417_s12, 0  ;;  %p185_p3 = scmp.ne.s32.totalorder %s1409_s10, %s1405_s30 }
   0xf   : > { %p186_p4 = scmp.eq.s32.totalorder %s1498_s13, 0  ;;  %p209_p7 = scmp.eq.s32.totalorder %s1498_s13, 1 }
  0x10   : > { %s1514_s18 = scalar_select %p170_p1, %s1413_s11, %s172_s16  }
  0x11   : > { %p1516_p5 = por %p180_p2, %p179_p0  ;;  %p1520_p6 = por %p186_p4, %p185_p3 }
  0x12   : > { %1877 = sst [smem:[#allocation13_spill]] %s1514_s18  ;;  %p215_p8 = scmp.eq.s32.totalorder %s1869_s14, 1 }
  0x13   : > { %s1879_s20 = scalar_select %p1520_p6, 1, 0 }
  0x14   : > { %p1224_p10 = scmp.lt.s32.totalorder %s1417_s12, 2  ;;  %p1529_p11 = por %p209_p7, %p179_p0 }
  0x15   : > { %p1533_p12 = por %p215_p8, %p185_p3  ;;  %s312_s23 = sand.u32 1, %s1413_s11  }
  0x16   : > { %s1880_s21 = scalar_select %p1529_p11, 1, 0 }
  0x17   : > { %s1881_s22 = scalar_select %p1533_p12, 1, 0 }
  0x18   : > { %s1076_s24 = sshll.u32 %s1417_s12, 8  ;;  %s1055_s25 = sshll.u32 %s312_s23, 3 }
  0x19   : > { %s1542_s28 = scalar_lea.hbm %s1865_s6, %s1076_s24  ;;  %s316_s29 = scalar_lea.vmem [#allocation2], %s1055_s25 }
  0x1a   : > { %s324_s16 = sshll.u32 %s316_s29, 4  ;;  %p1546_p13 = pnand %p1224_p10, %p1516_p5  ;;  %s1550_s16 = int_to_ptr.vmem [resolvable:$true] %s324_s16 }
  0x1b   : > { %s313_s14 = scalar_lea.sflag [#allocation3], %s312_s23  ;;  %s1268_s18 = scalar_lea.hbm %s1542_s28, 128 }
  0x1c   : > { %p1269_p2 = scmp.ne.s32.totalorder %s1542_s28, %s1268_s18  ;;  %p1270_p3 = pneg %p1546_p13 }
  0x1d   : > { %s1273_s19 = scalar_lea.hbm %s1865_s6, 512  ;;  %p1274_p5 = scmp.lt.s32.totalorder %s1542_s28, %s1865_s6 }
  0x1e   : > { %p1271_p4 = pnand %p1270_p3, %p1269_p2  ;;  %p1275_p8 = scmp.lt.s32.totalorder %s1273_s19, %s1268_s18 }
  0x20   : > { %p1272_p7 = pneg %p1271_p4  ;;  %p1276_p10 = por %p1275_p8, %p1274_p5 }
  0x22   : > { %p1277_p9 = pnand %p1276_p10, %p1272_p7 }
  0x24   : > { %1280 = shalt.err (!%p1277_p9)
}
  0x25   : > { %s1281_s23 = scalar_lea.vmem %s1550_s16, 128  ;;  %s1419_s29 = smov [#allocation2]  }
  0x26   : > { %p1282_p0 = scmp.ne.s32.totalorder %s1550_s16, %s1281_s23  ;;  %s1286_s11 = sshll.u32 %s1419_s29, 4  ;;  %s1287_s11 = int_to_ptr.vmem [resolvable:$false] %s1286_s11 }
  0x27   : > { %s1288_s24 = scalar_lea.vmem %s1287_s11, 256  ;;  %p1289_p4 = scmp.lt.s32.totalorder %s1550_s16, %s1287_s11 }
  0x28   : > { %p1284_p1 = pnand %p1282_p0, %p1270_p3  ;;  %p1290_p12 = scmp.lt.s32.totalorder %s1288_s24, %s1281_s23 }
  0x2a   : > { %p1285_p2 = pneg %p1284_p1  ;;  %p1291_p11 = por %p1290_p12, %p1289_p4 }
  0x2c   : > { %p1292_p6 = pnand %p1291_p11, %p1285_p2 }
  0x2e   : > { %1295 = shalt.err (!%p1292_p6)
}
  0x2f   : > { %1213 = dma.hbm_to_vmem [thread:$0]  (!%p1546_p13), %s1542_s28, 128, %s1550_s16, %s313_s14  }
  0x30   : > { %p1883_p9 = scmp.lt.s32.totalorder %s1417_s12, 3  ;;  %p1884_p7 = scmp.ge.s32.totalorder %s1417_s12, 1 }
  0x32   : > { %p330_p0 = pnand %p1884_p7, %p1883_p9 }
  0x33   : > { %s1577_s18 = sand.u32 (!%p330_p0), 1, %s1409_s10   ;;  %p1885_p6 = scmp.ne.s32.totalorder (!%p330_p0), %s1879_s20, 0 }
  0x34   : > { %333 = sbr.rel (%p330_p0) target bundleno = 544 (0x220), region = 48  ;;  %s1580_s11 = sshll.u32 (!%p330_p0), %s1577_s18, 3 }
  0x35   : > { %s336_s25 = scalar_lea.sflag (!%p330_p0), [#allocation3], %s1577_s18 }
  0x39   : > { %1392 = dma.done.wait (%p1885_p6), %s336_s25, 128  }
  0x3a   : > { %1394 = vsyncadd (%p1885_p6), %s336_s25, 4294967168  ;;  %v1420_v0 = vmov 0.0   ;;  %vm1421_vm0 = vmmov 0   ;;  %p390_p11 = scmp.lt.s32.totalorder %s1498_s13, 1  ;;  %v414_v1 = vld [vmem:[%s1861_s2 + $0x78] sm:$0xff]  ;;  %v413_v3 = vld [vmem:[%s1861_s2 + $0x70] sm:$0xff]  ;;  %v434_v42 = vlaneseq }
  0x3b   : > { %1118 = vmatprep.subr.mxu0 %v1420_v0  ;;  %1153 = vmatprep.subr.mxu1 %v1420_v0  ;;  %v430_v2 = vld [vmem:[%s1862_s3 + $0x78] sm:$0xff]  ;;  %v429_v4 = vld [vmem:[%s1862_s3 + $0x70] sm:$0xff]  ;;  %v412_v5 = vld [vmem:[%s1861_s2 + $0x68] sm:$0xff]  ;;  %s1886_s0 = sld [smem:[#allocation14_spill]]  ;;  %s1422_s20 = smov 16   ;;  %vm849_vm3 = vcmask 122880  }
  0x3c   : > { %1150 = vmatprep.mubr.msk.f32.mxu0 %vm1421_vm0, %v1420_v0  ;;  %1185 = vmatprep.mubr.msk.f32.mxu1 %vm1421_vm0, %v1420_v0  ;;  %s1605_s27 = scalar_select %p390_p11, %s1498_s13, 1  ;;  %v428_v6 = vld [vmem:[%s1862_s3 + $0x68] sm:$0xff]  ;;  %v411_v7 = vld [vmem:[%s1861_s2 + $0x60] sm:$0xff]  ;;  %v410_v9 = vld [vmem:[%s1861_s2 + $0x58] sm:$0xff]  ;;  %v435_v43 = vshrl.u32 %v434_v42, 7  ;;  %vm672_vm4 = vcmask 130048  }
  0x3d   : > { %1119 = vmatpush3.msra.mxu0 %v414_v1  ;;  %1154 = vmatpush3.msra.mxu1 %v430_v2  ;;  %v427_v8 = vld [vmem:[%s1862_s3 + $0x60] sm:$0xff]  ;;  %v426_v10 = vld [vmem:[%s1862_s3 + $0x58] sm:$0xff]  ;;  %v409_v11 = vld [vmem:[%s1861_s2 + $0x50] sm:$0xff]  ;;  %s1423_s19 = smov 112   ;;  %s382_s24 = scalar_lea.vmem [#allocation6], %s1577_s18 }
  0x3e   : > { %1120 = vmatprep.subr.mxu0 %v1420_v0  ;;  %1155 = vmatprep.subr.mxu1 %v1420_v0  ;;  %s1062_s23 = sshll.u32 %s1605_s27, 3  ;;  %v425_v12 = vld [vmem:[%s1862_s3 + $0x50] sm:$0xff]  ;;  %v408_v13 = vld [vmem:[%s1861_s2 + $0x48] sm:$0xff]  ;;  %v407_v17 = vld [vmem:[%s1861_s2 + $0x40] sm:$0xff]  ;;  %v440_v44 = vand.u32 7, %v435_v43  ;;  %v1759_v58 = vsub.s32 0, %v435_v43 }
  0x3f   : > { %1121 = vmatpush3.msra.mxu0 %v413_v3  ;;  %1156 = vmatpush3.msra.mxu1 %v429_v4  ;;  %v424_v14 = vld [vmem:[%s1862_s3 + $0x48] sm:$0xff]  ;;  %v423_v18 = vld [vmem:[%s1862_s3 + $0x40] sm:$0xff]  ;;  %v406_v20 = vld [vmem:[%s1861_s2 + $0x38] sm:$0xff]  ;;  %v466_v59 = vsub.s32 1, %v435_v43  ;;  %s1887_s1 = sld [smem:[#allocation15_spill]]  ;;  %v474_v62 = vsub.s32 2, %v435_v43 }
  0x40   : > { %1122 = vmatprep.subr.mxu0 %v1420_v0  ;;  %1157 = vmatprep.subr.mxu1 %v1420_v0  ;;  %v422_v21 = vld [vmem:[%s1862_s3 + $0x38] sm:$0xff]  ;;  %v405_v22 = vld [vmem:[%s1861_s2 + $0x30] sm:$0xff]  ;;  %v404_v25 = vld [vmem:[%s1861_s2 + $0x28] sm:$0xff]  ;;  %vm448_vm1 = vcmp.ge.s32.totalorder %v440_v44, 1  ;;  %vm451_vm2 = vcmp.le.s32.totalorder %v440_v44, 6  ;;  %v482_v63 = vsub.s32 3, %v435_v43 }
  0x41   : > { %1123 = vmatpush3.msra.mxu0 %v412_v5  ;;  %1158 = vmatpush3.msra.mxu1 %v428_v6  ;;  %s393_s16 = scalar_lea.vmem %s1886_s0, %s1062_s23  ;;  %v421_v23 = vld [vmem:[%s1862_s3 + $0x30] sm:$0xff]  ;;  %v420_v26 = vld [vmem:[%s1862_s3 + $0x28] sm:$0xff]  ;;  %v403_v27 = vld [vmem:[%s1861_s2 + $0x20] sm:$0xff]  ;;  %v1063_v47 = vsel %vm448_vm1, 1.0, %v1420_v0  ;;  %v1064_v48 = vsel %vm451_vm2, 1.0, %v1420_v0  ;;  %v488_v1 = vsub.s32 4, %v435_v43 }
  0x42   : > { %1124 = vmatprep.subr.mxu0 %v1420_v0  ;;  %1159 = vmatprep.subr.mxu1 %v1420_v0  ;;  %v1654_v15 = vld [vmem:[%s393_s16] sm:$0xff]  ;;  %v402_v30 = vld [vmem:[%s1861_s2 + $0x18] sm:$0xff]  ;;  %v401_v32 = vld [vmem:[%s1861_s2 + $0x10] sm:$0xff]  ;;  %s396_s16 = scalar_lea.vmem %s1864_s5, %s1605_s27  ;;  %v496_v2 = vsub.s32 5, %v435_v43  ;;  %s1873_s28 = scalar_lea.vmem [#allocation8], %s1580_s11 }
  0x43   : > { %1125 = vmatpush3.msra.mxu0 %v411_v7  ;;  %1160 = vmatpush3.msra.mxu1 %v427_v8  ;;  %v524_v16 = vrot.slane %v1654_v15, 4  ;;  %v419_v28 = vld [vmem:[%s1862_s3 + $0x20] sm:$0xff]  ;;  %v418_v31 = vld [vmem:[%s1862_s3 + $0x18] sm:$0xff]  ;;  %v417_v33 = vld [vmem:[%s1862_s3 + $0x10] sm:$0xff]  ;;  %v454_v45 = vrot.slane %v1654_v15, 7  ;;  %v500_v46 = vrot.slane %v1654_v15, 1 }
  0x44   : > { %1126 = vmatprep.subr.mxu0 %v1420_v0  ;;  %1161 = vmatprep.subr.mxu1 %v1420_v0  ;;  %v400_v35 = vld [vmem:[%s1861_s2 + $0x8] sm:$0xff]  ;;  %v399_v37 = vld [vmem:[%s1861_s2] sm:$0xff]  ;;  %s887_s25 = sshll.u32 %s382_s24, 4  ;;  %p1888_p13 = scmp.ne.s32.totalorder %s1880_s21, 0  ;;  %s888_s25 = int_to_ptr.vmem [resolvable:$true] %s887_s25 }
  0x45   : > { %1127 = vmatpush3.msra.mxu0 %v410_v9  ;;  %1162 = vmatpush3.msra.mxu1 %v426_v10  ;;  %v525_v19 = vadd.f32 %v524_v16, %v1654_v15  ;;  %v416_v36 = vld [vmem:[%s1862_s3 + $0x8] sm:$0xff]  ;;  %v415_v38 = vld [vmem:[%s1862_s3] sm:$0xff]  ;;  %v455_v49 = vmul.f32 %v1063_v47, %v454_v45  ;;  %v501_v50 = vmul.f32 %v1064_v48, %v500_v46  ;;  %s1296_s23 = scalar_lea.vmem %s888_s25, 16  ;;  %s1424_s14 = smov [#allocation6]  }
  0x46   : > { %1128 = vmatprep.subr.mxu0 %v1420_v0  ;;  %1163 = vmatprep.subr.mxu1 %v1420_v0  ;;  %v432_v40 = vld [vmem:[%s1863_s4 + $0x8] sm:$0xff]  ;;  %v431_v41 = vld [vmem:[%s1863_s4] sm:$0xff]  ;;  %p1297_p12 = scmp.ne.s32.totalorder %s888_s25, %s1296_s23  ;;  %s1300_s17 = sshll.u32 %s1424_s14, 4  ;;  %s1301_s17 = int_to_ptr.vmem [resolvable:$false] %s1300_s17 }
  0x47   : > { %1129 = vmatpush3.msra.mxu0 %v409_v11  ;;  %1164 = vmatpush3.msra.mxu1 %v425_v12  ;;  %v526_v24 = vrot.slane %v525_v19, 2  ;;  %v670_v51 = vld [vmem:[%s396_s16] sm:$0x1]  ;;  %v506_v11 = vsub.s32 6, %v435_v43  ;;  %p1303_p5 = scmp.lt.s32.totalorder %s888_s25, %s1301_s17 }
  0x48   : > { %1130 = vmatprep.subr.mxu0 %v1420_v0  ;;  %1165 = vmatprep.subr.mxu1 %v1420_v0  ;;  %v397_v61 = vld [vmem:[%s1887_s1] sm:$0xff]  ;;  %p1298_p1 = pnand %p1297_p12, %p1888_p13 }
  0x49   : > { %1131 = vmatpush3.msra.mxu0 %v408_v13  ;;  %1166 = vmatpush3.msra.mxu1 %v424_v14  ;;  %v527_v29 = vadd.f32 %v526_v24, %v525_v19  ;;  %v461_v3 = vrot.slane %v397_v61, %v1759_v58  ;;  %v467_v4 = vrot.slane %v397_v61, %v466_v59 }
  0x4a   : > { %1132 = vmatprep.subr.mxu0 %v1420_v0  ;;  %1167 = vmatprep.subr.mxu1 %v1420_v0  ;;  %v475_v5 = vrot.slane %v397_v61, %v474_v62  ;;  %v483_v6 = vrot.slane %v397_v61, %v482_v63  ;;  %v489_v10 = vrot.slane %v397_v61, %v488_v1  ;;  %p1299_p3 = pneg %p1298_p1 }
  0x4b   : > { %1133 = vmatpush3.msra.mxu0 %v407_v17  ;;  %1168 = vmatpush3.msra.mxu1 %v423_v18  ;;  %v528_v34 = vrot.slane %v527_v29, 1  ;;  %v468_v8 = vmul.f32 %v467_v4, %v455_v49  ;;  %v497_v16 = vrot.slane %v397_v61, %v496_v2  ;;  %v512_v17 = vsub.s32 7, %v435_v43 }
  0x4c   : > { %1134 = vmatprep.subr.mxu0 %v1420_v0  ;;  %1169 = vmatprep.subr.mxu1 %v1420_v0 }
  0x4d   : > { %1135 = vmatpush3.msra.mxu0 %v406_v20  ;;  %1170 = vmatpush3.msra.mxu1 %v422_v21  ;;  %v529_v39 = vadd.f32 %v528_v34, %v527_v29  ;;  %v490_v20 = vmul.f32 %v489_v10, %v1654_v15  ;;  %v507_v21 = vrot.slane %v397_v61, %v506_v11  ;;  %v1065_v29 = vld [vmem:[%s1887_s1 + $0x8] ss:$0 sm:$0xff] }
  0x4e   : > { %1136 = vmatprep.subr.mxu0 %v1420_v0  ;;  %1171 = vmatprep.subr.mxu1 %v1420_v0 }
  0x4f   : > { %1137 = vmatpush3.msra.mxu0 %v405_v22  ;;  %1172 = vmatpush3.msra.mxu1 %v421_v23 }
  0x50   : > { %1138 = vmatprep.subr.mxu0 %v1420_v0  ;;  %1173 = vmatprep.subr.mxu1 %v1420_v0 }
  0x51   : > { %1139 = vmatpush3.msra.mxu0 %v404_v25  ;;  %1174 = vmatpush3.msra.mxu1 %v420_v26  ;;  %v513_v25 = vrot.slane %v397_v61, %v512_v17 }
  0x52   : > { %1140 = vmatprep.subr.mxu0 %v1420_v0  ;;  %1175 = vmatprep.subr.mxu1 %v1420_v0 }
  0x53   : > { %1141 = vmatpush3.msra.mxu0 %v403_v27  ;;  %1176 = vmatpush3.msra.mxu1 %v419_v28 }
  0x54   : > { %1142 = vmatprep.subr.mxu0 %v1420_v0  ;;  %1177 = vmatprep.subr.mxu1 %v1420_v0 }
  0x55   : > { %1143 = vmatpush3.msra.mxu0 %v402_v30  ;;  %1178 = vmatpush3.msra.mxu1 %v418_v31 }
  0x56   : > { %1144 = vmatprep.subr.mxu0 %v1420_v0  ;;  %1179 = vmatprep.subr.mxu1 %v1420_v0 }
  0x57   : > { %1145 = vmatpush3.msra.mxu0 %v401_v32  ;;  %1180 = vmatpush3.msra.mxu1 %v417_v33 }
  0x58   : > { %1146 = vmatprep.subr.mxu0 %v1420_v0  ;;  %1181 = vmatprep.subr.mxu1 %v1420_v0 }
  0x59   : > { %1147 = vmatpush3.msra.mxu0 %v400_v35  ;;  %1182 = vmatpush3.msra.mxu1 %v416_v36 }
  0x5a   : > { %1148 = vmatprep.subr.mxu0 %v1420_v0  ;;  %1183 = vmatprep.subr.mxu1 %v1420_v0 }
  0x5b   : > { %1149 = vmatpush3.msra.mxu0 %v399_v37  ;;  %1184 = vmatpush3.msra.mxu1 %v415_v38 }
  0x5c   : > { %1151 = vmatmul.mubr.f32.vlgmr.msra.gmra.mxu0 %v529_v39  ;;  %1186 = vmatmul.mubr.f32.vlgmr.msra.gmra.mxu1 %v529_v39 }
  0x5d   : > { %1188 = vmatprep.subr.mxu0 %v1420_v0  ;;  %1195 = vmatprep.subr.mxu1 %v1420_v0 }
  0x5e   : > { %1189 = vmatpush3.msra.mxu0 %v432_v40  ;;  %1196 = vmatpush3.msra.mxu1 %v432_v40 }
  0x5f   : > { %1190 = vmatprep.subr.mxu0 %v1420_v0  ;;  %1197 = vmatprep.subr.mxu1 %v1420_v0 }
  0x60   : > { %1192 = vmatprep.mubr.msk.f32.mxu0 %vm1421_vm0, %v1420_v0  ;;  %1199 = vmatprep.mubr.msk.f32.mxu1 %vm1421_vm0, %v1420_v0 }
  0x61   : > { %1191 = vmatpush3.msra.mxu0 %v431_v41  ;;  %1198 = vmatpush3.msra.mxu1 %v431_v41 }
  0x62   : > { %478 = vrot.lane.b32.xlu1 %v1654_v15, %s1422_s20  ;;  %456 = vrot.lane.b32.xlu0 %v455_v49, %s1422_s20 }
  0x66   : > { %492 = vrot.lane.b32.xlu1 %v1654_v15, %s1423_s19  ;;  %470 = vrot.lane.b32.xlu0 %v455_v49, %s1423_s19  ;;  %v514_v15 = vmul.f32 %v513_v25, %v501_v50 }
  0x6a   : > { %516 = vrot.lane.b32.xlu1 %v501_v50, %s1423_s19  ;;  %502 = vrot.lane.b32.xlu0 %v501_v50, %s1422_s20  ;;  %s856_s20 = sand.u32 1, %s1498_s13   ;;  %s1071_s19 = sshll.u32 %s1498_s13, 4 }
  0x6b   : > { %s885_s16 = scalar_lea.hbm %s1867_s8, %s1071_s19  ;;  %s1782_s27 = scalar_lea.sflag [#allocation7], %s856_s20 }
  0xd4   : > { %v457_v60 = vpop.permute.xlu0 %456  ;;  %v479_v0 = vpop.permute.xlu1 %478 }
  0xd5   : > { %v462_v7 = vmul.f32 %v461_v3, %v457_v60  ;;  %v484_v14 = vmul.f32 %v483_v6, %v479_v0 }
  0xd7   : > { %v469_v13 = vadd.f32 %v468_v8, %v462_v7 }
  0xd8   : > { %v471_v9 = vpop.permute.xlu0 %470  ;;  %v493_v18 = vpop.permute.xlu1 %492 }
  0xd9   : > { %v476_v12 = vmul.f32 %v475_v5, %v471_v9  ;;  %v498_v24 = vmul.f32 %v497_v16, %v493_v18 }
  0xdb   : > { %v477_v19 = vadd.f32 %v476_v12, %v469_v13 }
  0xdc   : > { %v503_v22 = vpop.permute.xlu0 %502  ;;  %v517_v28 = vpop.permute.xlu1 %516 }
  0xdd   : > { %v485_v23 = vadd.f32 %v484_v14, %v477_v19  ;;  %v508_v27 = vmul.f32 %v507_v21, %v503_v22  ;;  %v522_v32 = vmul.f32 %v1065_v29, %v517_v28 }
  0xdf   : > { %v491_v26 = vadd.f32 %v490_v20, %v485_v23 }
  0xe1   : > { %v499_v30 = vadd.f32 %v498_v24, %v491_v26 }
  0xe3   : > { %v509_v31 = vadd.f32 %v508_v27, %v499_v30 }
  0xe5   : > { %v515_v33 = vadd.f32 %v514_v15, %v509_v31 }
  0xe7   : > { %v1769_v34 = vadd.f32 %v522_v32, %v515_v33 }
  0xe9   : > { %848 = vst [vmem:[%s1873_s28] sm:$0xff] %v1769_v34  ;;  %s1302_s28 = scalar_lea.vmem %s1301_s17, 32 }
  0xea   : > { %p1304_p8 = scmp.lt.s32.totalorder %s1302_s28, %s1296_s23 }
  0xec   : > { %p1305_p10 = por %p1304_p8, %p1303_p5 }
  0xee   : > { %p1306_p2 = pnand %p1305_p10, %p1299_p3 }
 0x11c   : > { %v596_v52 = vpop.f32.mrf.mxu0  ;;  %v666_v53 = vpop.f32.mrf.mxu1 }
 0x11d   : > { %v671_v54 = vmul.f32 %v670_v51, %v596_v52  ;;  %v746_v55 = vmul.f32 %v666_v53, %v596_v52  ;;  %850 = vst.msk [vmem:[%s382_s24] sm:$0x1] %vm849_vm3, %v666_v53 }
 0x11e   : > { %v1152_v56 = vpop.f32.mrf.mxu0  ;;  %v1187_v57 = vpop.f32.mrf.mxu1 }
 0x11f   : > { %1193 = vmatmul.mubr.msk.f32.vlgmr.msra.gmra.mxu0 %vm672_vm4, %v671_v54  ;;  %1200 = vmatmul.mubr.msk.f32.vlgmr.msra.gmra.mxu1 %vm672_vm4, %v746_v55 }
 0x120   : > { %1309 = shalt.err (!%p1306_p2)
}
 0x121   : > { %s1310_s19 = scalar_lea.hbm %s885_s16, 16  ;;  %s1314_s26 = scalar_lea.hbm %s1867_s8, 32 }
 0x122   : > { %p1311_p4 = scmp.ne.s32.totalorder %s885_s16, %s1310_s19  ;;  %p1315_p0 = scmp.lt.s32.totalorder %s885_s16, %s1867_s8 }
 0x123   : > { %p1316_p6 = scmp.lt.s32.totalorder %s1314_s26, %s1310_s19 }
 0x124   : > { %p1312_p9 = pnand %p1311_p4, %p1888_p13 }
 0x125   : > { %p1317_p11 = por %p1316_p6, %p1315_p0 }
 0x126   : > { %p1313_p7 = pneg %p1312_p9 }
 0x128   : > { %p1318_p12 = pnand %p1317_p11, %p1313_p7 }
 0x12a   : > { %1321 = shalt.err (!%p1318_p12)
}
 0x12b   : > { %1205 = dma.vmem_to_hbm [thread:$0]  (%p1888_p13), %s888_s25, 16, %s885_s16, %s1782_s27  }
 0x12c   : > { %s1077_s17 = sshll.u32 %s1498_s13, 8  ;;  %s1889_s28 = scalar_lea.vmem [#allocation8], %s1580_s11 }
 0x12d   : > { %s902_s23 = sshll.u32 %s1889_s28, 4  ;;  %s988_s20 = scalar_lea.hbm %s1868_s9, %s1077_s17  ;;  %s903_s23 = int_to_ptr.vmem [resolvable:$true] %s902_s23 }
 0x12e   : > { %s989_s0 = scalar_lea.hbm %s988_s20, 128  ;;  %s1322_s19 = scalar_lea.vmem %s903_s23, 128 }
 0x12f   : > { %p1323_p1 = scmp.ne.s32.totalorder %s903_s23, %s1322_s19  ;;  %s1425_s26 = smov [#allocation8]  }
 0x130   : > { %s1326_s29 = sshll.u32 %s1425_s26, 4  ;;  %s1327_s29 = int_to_ptr.vmem [resolvable:$false] %s1326_s29 }
 0x131   : > { %p1324_p3 = pnand %p1323_p1, %p1888_p13  ;;  %s1328_s1 = scalar_lea.vmem %s1327_s29, 256 }
 0x132   : > { %p1329_p8 = scmp.lt.s32.totalorder %s903_s23, %s1327_s29  ;;  %p1330_p10 = scmp.lt.s32.totalorder %s1328_s1, %s1322_s19 }
 0x133   : > { %p1325_p5 = pneg %p1324_p3 }
 0x134   : > { %p1331_p2 = por %p1330_p10, %p1329_p8 }
 0x136   : > { %p1332_p4 = pnand %p1331_p2, %p1325_p5 }
 0x138   : > { %1335 = shalt.err (!%p1332_p4)
}
 0x139   : > { %s1348_s16 = scalar_lea.hbm %s988_s20, 256  ;;  %s1340_s28 = scalar_lea.hbm %s1868_s9, 512 }
 0x13a   : > { %p1337_p9 = scmp.ne.s32.totalorder %s989_s0, %s1348_s16  ;;  %p1341_p6 = scmp.lt.s32.totalorder %s989_s0, %s1868_s9 }
 0x13b   : > { %p1342_p11 = scmp.lt.s32.totalorder %s1340_s28, %s1348_s16 }
 0x13c   : > { %p1338_p7 = pnand %p1337_p9, %p1888_p13 }
 0x13d   : > { %p1343_p12 = por %p1342_p11, %p1341_p6 }
 0x13e   : > { %p1339_p0 = pneg %p1338_p7 }
 0x140   : > { %p1344_p1 = pnand %p1343_p12, %p1339_p0 }
 0x142   : > { %1347 = shalt.err (!%p1344_p1)
}
 0x143   : > { %1206 = dma.vmem_to_hbm [thread:$0]  (%p1888_p13), %s903_s23, 128, %s989_s0, %s1782_s27  }
 0x144   : > { %s1890_s1 = scalar_lea.vmem [#allocation2], %s1580_s11  ;;  %s1070_s27 = sshll.u32 %s1498_s13, 7 }
 0x145   : > { %v839_v53 = vld [vmem:[%s1890_s1] sm:$0xff]  ;;  %s376_s23 = scalar_lea.vmem [#allocation5], %s1580_s11  ;;  %s872_s26 = scalar_lea.hbm %s1866_s7, %s1070_s27 }
 0x146   : > { %s874_s20 = sshll.u32 %s376_s23, 4  ;;  %s852_s29 = scalar_lea.sflag [#allocation4], %s1577_s18  ;;  %s875_s20 = int_to_ptr.vmem [resolvable:$true] %s874_s20 }
 0x147   : > { %s1349_s16 = scalar_lea.vmem %s875_s20, 128  ;;  %s1426_s25 = smov [#allocation5]  }
 0x148   : > { %p1350_p3 = scmp.ne.s32.totalorder %s875_s20, %s1349_s16  ;;  %s1353_s13 = sshll.u32 %s1426_s25, 4  ;;  %s1354_s13 = int_to_ptr.vmem [resolvable:$false] %s1353_s13 }
 0x149   : > { %s1355_s11 = scalar_lea.vmem %s1354_s13, 256  ;;  %p1356_p10 = scmp.lt.s32.totalorder %s875_s20, %s1354_s13 }
 0x14a   : > { %p1351_p5 = pnand %p1350_p3, %p1888_p13  ;;  %p1357_p2 = scmp.lt.s32.totalorder %s1355_s11, %s1349_s16 }
 0x14c   : > { %p1352_p8 = pneg %p1351_p5  ;;  %p1358_p4 = por %p1357_p2, %p1356_p10 }
 0x14e   : > { %p1359_p9 = pnand %p1358_p4, %p1352_p8 }
 0x1df   : > { %v742_v35 = vpop.f32.mrf.mxu0  ;;  %v816_v36 = vpop.f32.mrf.mxu1 }
 0x1e0   : > { %v820_v37 = vmax.f32 %v742_v35, %v816_v36 }
 0x1e1   : > { %v1194_v38 = vpop.f32.mrf.mxu0  ;;  %v1201_v39 = vpop.f32.mrf.mxu1 }
 0x1e2   : > { %v821_v40 = vsub.f32 %v742_v35, %v820_v37  ;;  %v824_v41 = vsub.f32 %v816_v36, %v820_v37 }
 0x1e4   : > { %v822_v42 = vmul.f32 1.442695, %v821_v40  ;;  %v825_v43 = vmul.f32 1.442695, %v824_v41 }
 0x1e6   : > { %1262 = vpow2.f32 %v822_v42 }
 0x1e7   : > { %1264 = vpow2.f32 %v825_v43 }
 0x1f3   : > { %v1263_v44 = vpop.eup %1262 }
 0x1f4   : > { %v1265_v45 = vpop.eup %1264 }
 0x1f5   : > { %v828_v46 = vadd.f32 %v1265_v45, %v1263_v44 }
 0x1f7   : > { %1266 = vrcp.f32 %v828_v46 }
 0x204   : > { %v1267_v47 = vpop.eup %1266 }
 0x205   : > { %v830_v48 = vmul.f32 %v1267_v47, %v828_v46 }
 0x207   : > { %v831_v49 = vsub.f32 2.0, %v830_v48 }
 0x209   : > { %v832_v50 = vmul.f32 %v1267_v47, %v831_v49 }
 0x20b   : > { %v833_v51 = vmul.f32 %v1265_v45, %v832_v50  ;;  %v840_v52 = vmul.f32 %v1263_v44, %v832_v50 }
 0x20d   : > { %v837_v54 = vrot.slane %v833_v51, %v1759_v58  ;;  %v844_v55 = vrot.slane %v840_v52, %v1759_v58 }
 0x20f   : > { %v838_v56 = vmul.f32 %v837_v54, %v1769_v34  ;;  %v845_v57 = vmul.f32 %v844_v55, %v839_v53 }
 0x211   : > { %v846_v59 = vadd.f32 %v845_v57, %v838_v56 }
 0x213   : > { %847 = vst [vmem:[%s376_s23] sm:$0xff] %v846_v59 }
 0x214   : > { %1362 = shalt.err (!%p1359_p9)
}
 0x215   : > { %s1363_s17 = scalar_lea.hbm %s872_s26, 128  ;;  %s1367_s14 = scalar_lea.hbm %s1866_s7, 256 }
 0x216   : > { %p1364_p7 = scmp.ne.s32.totalorder %s872_s26, %s1363_s17  ;;  %p1368_p11 = scmp.lt.s32.totalorder %s872_s26, %s1866_s7 }
 0x217   : > { %p1369_p12 = scmp.lt.s32.totalorder %s1367_s14, %s1363_s17 }
 0x218   : > { %p1365_p0 = pnand %p1364_p7, %p1888_p13 }
 0x219   : > { %p1370_p1 = por %p1369_p12, %p1368_p11 }
 0x21a   : > { %p1366_p6 = pneg %p1365_p0 }
 0x21c   : > { %p1371_p3 = pnand %p1370_p1, %p1366_p6 }
 0x21e   : > { %1374 = shalt.err (!%p1371_p3)
}
 0x21f   : > { %1204 = dma.vmem_to_hbm [thread:$0]  (%p1888_p13), %s875_s20, 128, %s872_s26, %s852_s29  }
 0x220 PF: > { %s914_s27 = sand.u32 1, %s1405_s30   ;;  %p1891_p5 = scmp.ne.s32.totalorder %s1881_s22, 0 }
 0x221   : > { %p1892_p8 = scmp.ge.s32.totalorder %s1417_s12, 2  ;;  %s915_s23 = scalar_lea.sflag [#allocation4], %s914_s27 }
 0x223   : > { %p1215_p10 = pnand %p1892_p8, %p1891_p5 }
 0x225   : > { %p1216_p2 = pneg %p1215_p10 }
 0x227   : > { %1396 = dma.done.wait (%p1216_p2), %s915_s23, 128  }
 0x228   : > { %1398 = vsyncadd (%p1216_p2), %s915_s23, 4294967168  ;;  %s1893_s0 = sadd.s32 4294967294, %s1417_s12  }
 0x229   : > { %s923_s19 = sand.u32 1, %s1893_s0  }
 0x22a   : > { %s924_s16 = scalar_lea.sflag [#allocation7], %s923_s19 }
 0x22b   : > { %1400 = dma.done.wait (%p1216_p2), %s924_s16, 144  }
 0x22c   : > { %1402 = vsyncadd (%p1216_p2), %s924_s16, 4294967152  ;;  %s1894_s21 = sld [smem:[#allocation12_spill]]  ;;  %p26_p13 = scmp.ge.s32.totalorder %s1502_s15, 4  }
 0x22d   : > { %s1895_s11 = sld [smem:[#allocation13_spill]]  ;;  %s1896_s30 = smov %s1409_s10 }
 0x22e   : > { %s1898_s12 = smov %s1502_s15  ;;  %28 = sbr.rel (!%p26_p13) target bundleno = 10 (0xa), region = 131 }
 0x232   : > { %s1897_s10 = smov %s1894_s21 }
 0x233   :  { %937 = vsyncpa [#allocation3], 1 }
 0x234   :  { %939 = vsyncpa [#allocation3 + $0x1], 1 }
 0x235   :  { %940 = vsyncpa [#allocation4], 1 }
 0x236   :  { %942 = vsyncpa [#allocation4 + $0x1], 1 }
 0x237   :  { %943 = vsyncpa [#allocation7], 1 }
 0x238   :  { %945 = vsyncpa [#allocation7 + $0x1], 1 }

</bundles_post_ra>
